<compile_context>
chip_gen: v7x
topology: tpu7x:2x2x1
jax: 0.10.0
libtpu: 0.0.40
codegen_flags: <defaults>
</compile_context>

<pallas_src>
import jax
import jax.numpy as jnp
from jax.experimental import pallas as pl
from jax.experimental.pallas import tpu as pltpu


def _linear_kernel(x_ref, w_ref, b_ref, o_ref):
    # x_ref: (B, 2)  VMEM
    # w_ref: (2, 2)  SMEM, PyTorch layout (out_features, in_features)
    # b_ref: (2,)    SMEM
    # o_ref: (B, 2)  VMEM
    x = x_ref[...]                 # single full-tile vector load
    x0 = x[:, 0:1]                 # (B, 1)
    x1 = x[:, 1:2]                 # (B, 1)

    # nn.Linear semantics: y[:, j] = sum_i x[:, i] * W[j, i] + b[j]
    # Pure VPU broadcast-MACs with SMEM scalars; no MXU push/pop, no XLU
    # transpose.  (With W = identity this reduces to x + b, but we keep the
    # general Linear(2, 2) contraction.)
    o_ref[:, 0:1] = (x0 * w_ref[0, 0] + x1 * w_ref[0, 1] + b_ref[0]).astype(
        o_ref.dtype
    )
    o_ref[:, 1:2] = (x0 * w_ref[1, 0] + x1 * w_ref[1, 1] + b_ref[1]).astype(
        o_ref.dtype
    )


def net_forward(x, weight, bias):
    """Pallas equivalent of Net.forward.

    x:      (B, 2) float32
    weight: (2, 2) float32, PyTorch layout (out_features, in_features)
    bias:   (2,)   float32
    """
    B, _ = x.shape
    OUT = weight.shape[0]

    return pl.pallas_call(
        _linear_kernel,
        out_shape=jax.ShapeDtypeStruct((B, OUT), x.dtype),
        in_specs=[
            pl.BlockSpec(memory_space=pltpu.MemorySpace.VMEM),   # x
            pl.BlockSpec(memory_space=pltpu.MemorySpace.SMEM),   # weight
            pl.BlockSpec(memory_space=pltpu.MemorySpace.SMEM),   # bias
        ],
        out_specs=pl.BlockSpec(memory_space=pltpu.MemorySpace.VMEM),
    )(x, weight, bias)


if __name__ == "__main__":
    key = jax.random.PRNGKey(0)
    kx, kb = jax.random.split(key)

    B = 8
    x = jax.random.normal(kx, (B, 2), dtype=jnp.float32)

    # Parameters (deterministic):
    #   weight = identity (as set explicitly in Net.__init__)
    #   bias   = deterministic values standing in for nn.Linear's default init
    weight = jnp.eye(2, dtype=jnp.float32)
    bias = jax.random.uniform(
        kb, (2,), dtype=jnp.float32, minval=-(2.0 ** -0.5), maxval=2.0 ** -0.5
    )

    out = net_forward(x, weight, bias)
    out = jax.block_until_ready(out)

    # Reference check in plain JAX (same semantics as PyTorch nn.Linear).
    ref = x @ weight.T + bias
    assert jnp.allclose(out, ref, atol=1e-6), "mismatch vs reference"

    print("KERNEL_OK")
</pallas_src>

<mosaic_0001>
module attributes {stable_mosaic.version = 11 : i64} {
  func.func @_linear_kernel(%arg0: memref<8x2xf32, #tpu.memory_space<vmem>>, %arg1: memref<2x2xf32, #tpu.memory_space<smem>>, %arg2: memref<2xf32, #tpu.memory_space<smem>>, %arg3: memref<8x2xf32, #tpu.memory_space<vmem>>) attributes {dimension_semantics = [], scalar_prefetch = 0 : i64, scratch_operands = 0 : i64, tpu.core_type = #tpu.core_type<tc>} {
    %c0 = arith.constant 0 : index
    %c0_0 = arith.constant 0 : index
    %0 = vector.load %arg0[%c0, %c0_0] : memref<8x2xf32, #tpu.memory_space<vmem>>, vector<8x2xf32>
    %1 = vector.extract_strided_slice %0 {offsets = [0, 0], sizes = [8, 1], strides = [1, 1]} : vector<8x2xf32> to vector<8x1xf32>
    %2 = vector.extract_strided_slice %0 {offsets = [0, 1], sizes = [8, 1], strides = [1, 1]} : vector<8x2xf32> to vector<8x1xf32>
    %c0_1 = arith.constant 0 : index
    %c0_2 = arith.constant 0 : index
    %3 = memref.load %arg1[%c0_1, %c0_2] : memref<2x2xf32, #tpu.memory_space<smem>>
    %4 = vector.broadcast %3 : f32 to vector<8x1xf32>
    %5 = arith.mulf %1, %4 : vector<8x1xf32>
    %c0_3 = arith.constant 0 : index
    %c1 = arith.constant 1 : index
    %6 = memref.load %arg1[%c0_3, %c1] : memref<2x2xf32, #tpu.memory_space<smem>>
    %7 = vector.broadcast %6 : f32 to vector<8x1xf32>
    %8 = arith.mulf %2, %7 : vector<8x1xf32>
    %9 = arith.addf %5, %8 : vector<8x1xf32>
    %c0_4 = arith.constant 0 : index
    %10 = memref.load %arg2[%c0_4] : memref<2xf32, #tpu.memory_space<smem>>
    %11 = vector.broadcast %10 : f32 to vector<8x1xf32>
    %12 = arith.addf %9, %11 : vector<8x1xf32>
    %c0_5 = arith.constant 0 : index
    %c0_6 = arith.constant 0 : index
    %13 = vector.load %arg3[%c0_5, %c0_6] : memref<8x2xf32, #tpu.memory_space<vmem>>, vector<8x1xf32>
    tpu.vector_store %arg3[%c0_5, %c0_6], %12 {strides = array<i32>} : memref<8x2xf32, #tpu.memory_space<vmem>>, vector<8x1xf32>,
    %c1_7 = arith.constant 1 : index
    %c0_8 = arith.constant 0 : index
    %14 = memref.load %arg1[%c1_7, %c0_8] : memref<2x2xf32, #tpu.memory_space<smem>>
    %15 = vector.broadcast %14 : f32 to vector<8x1xf32>
    %16 = arith.mulf %1, %15 : vector<8x1xf32>
    %c1_9 = arith.constant 1 : index
    %c1_10 = arith.constant 1 : index
    %17 = memref.load %arg1[%c1_9, %c1_10] : memref<2x2xf32, #tpu.memory_space<smem>>
    %18 = vector.broadcast %17 : f32 to vector<8x1xf32>
    %19 = arith.mulf %2, %18 : vector<8x1xf32>
    %20 = arith.addf %16, %19 : vector<8x1xf32>
    %c1_11 = arith.constant 1 : index
    %21 = memref.load %arg2[%c1_11] : memref<2xf32, #tpu.memory_space<smem>>
    %22 = vector.broadcast %21 : f32 to vector<8x1xf32>
    %23 = arith.addf %20, %22 : vector<8x1xf32>
    %c0_12 = arith.constant 0 : index
    %c1_13 = arith.constant 1 : index
    %24 = vector.load %arg3[%c0_12, %c1_13] : memref<8x2xf32, #tpu.memory_space<vmem>>, vector<8x1xf32>
    tpu.vector_store %arg3[%c0_12, %c1_13], %23 {strides = array<i32>} : memref<8x2xf32, #tpu.memory_space<vmem>>, vector<8x1xf32>,
    return
  }
}

</mosaic_0001>

<bundles_post_ra>
// kernel: tpu_custom_call.1
= control target key start
LH: loop header
LB: loop body
LE: loop exit
PB: predicated region body
PF: predicated region fallthrough
CT: control target
= control target key end

     0   :  { %8 = vsyncpa [#allocation3], 0  ;;  %s157_s0 = inlined_call_operand.vmem [shape: f32[8,2], index: 0, kind: input, shape index: {}]   ;;  %s158_s1 = inlined_call_operand.vmem [shape: f32[2,2], index: 1, kind: input, shape index: {}]   ;;  %s159_s2 = inlined_call_operand.vmem [shape: f32[2], index: 2, kind: input, shape index: {}]   ;;  %s160_s3 = inlined_call_operand.vmem [shape: f32[8,2], index: 3, kind: output, shape index: {}]  }
   0x1   :  { %s18_s14 = sshll.u32 %s158_s1, 4  ;;  %s19_s14 = int_to_ptr.vmem [resolvable:$true] %s18_s14 }
   0x2   :  { %9 = vsyncpa [#allocation5], 0  ;;  %s28_s17 = sshll.u32 %s159_s2, 4  ;;  %s90_s18 = scalar_lea.vmem %s19_s14, 32  ;;  %s29_s17 = int_to_ptr.vmem [resolvable:$true] %s28_s17 }
   0x3   :  { %p91_p0 = scmp.ne.s32.totalorder %s19_s14, %s90_s18  ;;  %p95_p1 = scmp.lt.s32.totalorder %s19_s14, %s19_s14 }
   0x4   :  { %p96_p2 = scmp.lt.s32.totalorder %s90_s18, %s90_s18 }
   0x6   :  { %p97_p3 = por %p96_p2, %p95_p1 }
   0x8   :  { %p98_p4 = pnand %p97_p3, %p91_p0 }
   0xa   :  { %101 = shalt.err (!%p98_p4)
}
   0xb   :  { %s118_s19 = smov [#allocation2]   ;;  %s102_s20 = scalar_lea.vmem %s29_s17, 16 }
   0xc   :  { %21 = dma.vmem_to_smem %s19_s14, 32, %s118_s19, [#allocation3]  }
   0xd   :  { %p103_p5 = scmp.ne.s32.totalorder %s29_s17, %s102_s20  ;;  %p107_p6 = scmp.lt.s32.totalorder %s29_s17, %s29_s17 }
   0xe   :  { %p108_p7 = scmp.lt.s32.totalorder %s102_s20, %s102_s20 }
  0x10   :  { %p109_p8 = por %p108_p7, %p107_p6 }
  0x12   :  { %p110_p9 = pnand %p109_p8, %p103_p5 }
  0x14   :  { %113 = shalt.err (!%p110_p9)
}
  0x15   :  { %s119_s1 = smov [#allocation4]  }
  0x16   :  { %31 = dma.vmem_to_smem %s29_s17, 16, %s119_s1, [#allocation5]  }
  0x17   :  { %114 = dma.done.wait [#allocation3], 32  }
  0x18   :  { %115 = vsyncadd [#allocation3], 4294967264 }
  0x19   :  { %116 = dma.done.wait [#allocation5], 16  }
  0x1a   :  { %117 = vsyncadd [#allocation5], 4294967280 }
  0x1b   :  { %38 = sfence }
  0x1c   :  { %s84_s2 = sld [smem:[#allocation2 + $0x81]]  ;;  %v39_v0 = vld [vmem:[%s157_s0] sm:$0xff]  ;;  %s120_s24 = smov 127   ;;  %vm54_vm0 = vcmask 7168   ;;  %vm74_vm1 = vcmask 15368  }
  0x1d   :  { %s82_s21 = sld [smem:[#allocation2 + $0x1]]  ;;  %s83_s25 = sld [smem:[#allocation2 + $0x80]] }
  0x1e   :  { %s40_s26 = sld [smem:[#allocation2]]  ;;  %s85_s27 = sld [smem:[#allocation4 + $0x1]] }
  0x1f   :  { %s51_s28 = sld [smem:[#allocation4]]  ;;  %s121_s0 = smov 1  }
  0x22   :  { %v60_v1 = vstv %s84_s2 }
  0x23   :  { %v61_v2 = vmul.f32 %v60_v1, %v39_v0  ;;  %v44_v3 = vstv %s82_s21  ;;  %v57_v5 = vstv %s83_s25 }
  0x24   :  { %v45_v4 = vmul.f32 %v44_v3, %v39_v0  ;;  %v58_v6 = vmul.f32 %v57_v5, %v39_v0  ;;  %v41_v7 = vstv %s40_s26  ;;  %v68_v9 = vstv %s85_s27 }
  0x25   :  { %63 = vrot.lane.b32.xlu0 %v61_v2, %s120_s24  ;;  %v42_v11 = vmul.f32 %v41_v7, %v39_v0  ;;  %v52_v13 = vstv %s51_s28 }
  0x29   :  { %47 = vrot.lane.b32.xlu0 %v45_v4, %s120_s24 }
  0x97   :  { %v64_v8 = vpop.permute.xlu0 %63 }
  0x98   :  { %v66_v10 = vadd.f32 %v64_v8, %v58_v6 }
  0x9a   :  { %v69_v12 = vadd.f32 %v68_v9, %v66_v10 }
  0x9b   :  { %v48_v14 = vpop.permute.xlu0 %47 }
  0x9c   :  { %71 = vrot.lane.b32.xlu1 %v69_v12, %s121_s0  ;;  %v50_v15 = vadd.f32 %v48_v14, %v42_v11 }
  0x9e   :  { %v53_v16 = vadd.f32 %v52_v13, %v50_v15 }
  0xa0   :  { %55 = vst.msk [vmem:[%s160_s3] sm:$0xff] %vm54_vm0, %v53_v16 }
 0x10e   :  { %v72_v17 = vpop.permute.xlu1 %71 }
 0x10f   :  { %75 = vst.msk [vmem:[%s160_s3] sm:$0xff] %vm74_vm1, %v72_v17 }
 0x110   :  { %80 = vsyncpa [#allocation3], 1 }
 0x111   :  { %81 = vsyncpa [#allocation5], 1 }

</bundles_post_ra>
